<compile_context>
chip_gen: v5e
topology: v5e:2x2
jax: 0.10.0
libtpu: 0.0.40
codegen_flags: <defaults>
</compile_context>

<pallas_src>
import jax
import jax.numpy as jnp
from jax.experimental import pallas as pl
from jax.experimental.pallas import tpu as pltpu

PACK = 4      # batch rows packed per 128-lane row (4 * 32 = 128)
IN_CH = 32


def fcnn_kernel(x_ref, w1_ref, b1_ref, w2_ref, b2_ref, w3_ref, b3_ref, o_ref):
    # x_ref: (T, 128)   w1/w2: (128, 128)   w3: (128, 4)
    # b1/b2: (1, 128)   b3: (1, 4)          o_ref: (T, 4)
    h = jnp.dot(x_ref[...], w1_ref[...], preferred_element_type=jnp.float32) + b1_ref[...]
    h = jnp.dot(h, w2_ref[...], preferred_element_type=jnp.float32) + b2_ref[...]
    y = jnp.dot(h, w3_ref[...], preferred_element_type=jnp.float32) + b3_ref[...]
    o_ref[...] = y.astype(o_ref.dtype)


def fcnn_forward(x, params):
    """x: (..., 32) float32.  params: list of (W_t, b) with W_t shape (in, out)."""
    (w1, b1), (w2, b2), (w3, b3) = params
    lead = x.shape[:-1]
    C = x.shape[-1]
    assert PACK * C == 128, "lane packing assumes in_channels == 32"

    x2 = x.reshape(-1, C)
    B = x2.shape[0]

    # ---- block-diagonal weight / tiled bias expansion (layout only, exact) ----
    eye = jnp.eye(PACK, dtype=x.dtype)
    w1b = jnp.kron(eye, w1)                       # (128, 128)
    w2b = jnp.kron(eye, w2)                       # (128, 128)
    w3b = jnp.kron(eye, w3)                       # (128, 4)
    b1b = jnp.tile(b1, (1, PACK))                 # (1, 128)
    b2b = jnp.tile(b2, (1, PACK))                 # (1, 128)
    b3b = jnp.tile(b3, (1, PACK))                 # (1, 4)

    # ---- pack batch rows into 128-lane rows, pad to the tile grid ----
    rows = pl.cdiv(B, PACK)                       # packed rows needed
    tile_rows = min(512, ((rows + 7) // 8) * 8)   # 512 packed rows = 2048 batch rows/tile
    R = pl.cdiv(rows, tile_rows) * tile_rows
    B_pad = R * PACK

    x_pad = jnp.pad(x2, ((0, B_pad - B), (0, 0)))
    x_packed = x_pad.reshape(R, PACK * C)         # (R, 128)

    grid = (R // tile_rows,)
    const = lambda i: (0, 0)                      # weights / biases stay resident

    out_packed = pl.pallas_call(
        fcnn_kernel,
        out_shape=jax.ShapeDtypeStruct((R, PACK), x.dtype),
        grid=grid,
        in_specs=[
            pl.BlockSpec((tile_rows, PACK * C), lambda i: (i, 0)),  # x tile streams
            pl.BlockSpec((PACK * C, PACK * C), const),              # W1 block-diag
            pl.BlockSpec((1, PACK * C), const),                     # b1
            pl.BlockSpec((PACK * C, PACK * C), const),              # W2 block-diag
            pl.BlockSpec((1, PACK * C), const),                     # b2
            pl.BlockSpec((PACK * C, PACK), const),                  # W3 block-diag
            pl.BlockSpec((1, PACK), const),                         # b3
        ],
        out_specs=pl.BlockSpec((tile_rows, PACK), lambda i: (i, 0)),
        compiler_params=pltpu.CompilerParams(
            dimension_semantics=("parallel",)),   # batch axis shardable across TCs
    )(x_packed, w1b, b1b, w2b, b2b, w3b, b3b)

    # Unpack back to (..., 1); padded rows are discarded.
    return out_packed.reshape(B_pad, 1)[:B].reshape(*lead, 1)


def init_params(key, in_channels=IN_CH, depth=3):
    """Deterministic init mimicking nn.Linear's U(-1/sqrt(fan_in), 1/sqrt(fan_in))."""
    params = []
    dims = [(in_channels, in_channels)] * (depth - 1) + [(in_channels, 1)]
    for (fan_in, fan_out) in dims:
        key, kw, kb = jax.random.split(key, 3)
        bound = 1.0 / jnp.sqrt(fan_in)
        # stored transposed: (in, out), so forward is x @ W_t + b
        w_t = jax.random.uniform(kw, (fan_in, fan_out), jnp.float32, -bound, bound)
        b = jax.random.uniform(kb, (1, fan_out), jnp.float32, -bound, bound)
        params.append((w_t, b))
    return params


def fcnn_reference(x, params):
    """Pure-JAX layer-by-layer reference (matches the PyTorch module)."""
    for (w_t, b) in params:
        x = x @ w_t + b
    return x


if __name__ == "__main__":
    key = jax.random.PRNGKey(0)
    key, kx = jax.random.split(key)

    B, C = 8, IN_CH                       # small demo: batch=8, in_channels=32
    x = jax.random.normal(kx, (B, C), jnp.float32)
    params = init_params(key, in_channels=C, depth=3)

    out = fcnn_forward(x, params)
    out = jax.block_until_ready(out)

    ref = fcnn_reference(x, params)
    assert out.shape == (B, 1), out.shape
    assert jnp.allclose(out, ref, atol=1e-5, rtol=1e-5), (out, ref)

    print("KERNEL_OK")
</pallas_src>

<mosaic_0001>
module attributes {stable_mosaic.version = 11 : i64} {
  func.func @fcnn_kernel(%arg0: i32, %arg1: memref<8x128xf32, #tpu.memory_space<vmem>>, %arg2: memref<128x128xf32, #tpu.memory_space<vmem>>, %arg3: memref<1x128xf32, #tpu.memory_space<vmem>>, %arg4: memref<128x128xf32, #tpu.memory_space<vmem>>, %arg5: memref<1x128xf32, #tpu.memory_space<vmem>>, %arg6: memref<128x4xf32, #tpu.memory_space<vmem>>, %arg7: memref<1x4xf32, #tpu.memory_space<vmem>>, %arg8: memref<8x4xf32, #tpu.memory_space<vmem>>) attributes {dimension_semantics = [#tpu.dimension_semantics<parallel>], iteration_bounds = array<i64: 1>, scalar_prefetch = 0 : i64, scratch_operands = 0 : i64, tpu.core_type = #tpu.core_type<tc>, window_params = [{transform_indices = @transform_0, window_bounds = array<i64: 8, 128>}, {pipeline_mode = #tpu.pipeline_mode<synchronous>, transform_indices = @transform_1, window_bounds = array<i64: 128, 128>}, {pipeline_mode = #tpu.pipeline_mode<synchronous>, transform_indices = @transform_2, window_bounds = array<i64: 1, 128>}, {pipeline_mode = #tpu.pipeline_mode<synchronous>, transform_indices = @transform_3, window_bounds = array<i64: 128, 128>}, {pipeline_mode = #tpu.pipeline_mode<synchronous>, transform_indices = @transform_4, window_bounds = array<i64: 1, 128>}, {pipeline_mode = #tpu.pipeline_mode<synchronous>, transform_indices = @transform_5, window_bounds = array<i64: 128, 4>}, {pipeline_mode = #tpu.pipeline_mode<synchronous>, transform_indices = @transform_6, window_bounds = array<i64: 1, 4>}, {transform_indices = @transform_7, window_bounds = array<i64: 8, 4>}]} {
    %c0 = arith.constant 0 : index
    %c0_0 = arith.constant 0 : index
    %0 = vector.load %arg1[%c0, %c0_0] : memref<8x128xf32, #tpu.memory_space<vmem>>, vector<8x128xf32>
    %c0_1 = arith.constant 0 : index
    %c0_2 = arith.constant 0 : index
    %1 = vector.load %arg2[%c0_1, %c0_2] : memref<128x128xf32, #tpu.memory_space<vmem>>, vector<128x128xf32>
    %cst = arith.constant dense<0.000000e+00> : vector<8x128xf32>
    %2 = tpu.matmul %0, %1, %cst {dimension_numbers = #tpu.dot_dimension_numbers<[1], [0], [0], [1], [0, 0, 1, 1], [], []>} : vector<8x128xf32>, vector<128x128xf32>, vector<8x128xf32> -> vector<8x128xf32>
    %c0_3 = arith.constant 0 : index
    %c0_4 = arith.constant 0 : index
    %3 = vector.load %arg3[%c0_3, %c0_4] : memref<1x128xf32, #tpu.memory_space<vmem>>, vector<1x128xf32>
    %4 = vector.broadcast %3 : vector<1x128xf32> to vector<8x128xf32>
    %5 = arith.addf %2, %4 : vector<8x128xf32>
    %c0_5 = arith.constant 0 : index
    %c0_6 = arith.constant 0 : index
    %6 = vector.load %arg4[%c0_5, %c0_6] : memref<128x128xf32, #tpu.memory_space<vmem>>, vector<128x128xf32>
    %cst_7 = arith.constant dense<0.000000e+00> : vector<8x128xf32>
    %7 = tpu.matmul %5, %6, %cst_7 {dimension_numbers = #tpu.dot_dimension_numbers<[1], [0], [0], [1], [0, 0, 1, 1], [], []>} : vector<8x128xf32>, vector<128x128xf32>, vector<8x128xf32> -> vector<8x128xf32>
    %c0_8 = arith.constant 0 : index
    %c0_9 = arith.constant 0 : index
    %8 = vector.load %arg5[%c0_8, %c0_9] : memref<1x128xf32, #tpu.memory_space<vmem>>, vector<1x128xf32>
    %9 = vector.broadcast %8 : vector<1x128xf32> to vector<8x128xf32>
    %10 = arith.addf %7, %9 : vector<8x128xf32>
    %c0_10 = arith.constant 0 : index
    %c0_11 = arith.constant 0 : index
    %11 = vector.load %arg6[%c0_10, %c0_11] : memref<128x4xf32, #tpu.memory_space<vmem>>, vector<128x4xf32>
    %cst_12 = arith.constant dense<0.000000e+00> : vector<8x4xf32>
    %12 = tpu.matmul %10, %11, %cst_12 {dimension_numbers = #tpu.dot_dimension_numbers<[1], [0], [0], [1], [0, 0, 1, 1], [], []>} : vector<8x128xf32>, vector<128x4xf32>, vector<8x4xf32> -> vector<8x4xf32>
    %c0_13 = arith.constant 0 : index
    %c0_14 = arith.constant 0 : index
    %13 = vector.load %arg7[%c0_13, %c0_14] : memref<1x4xf32, #tpu.memory_space<vmem>>, vector<1x4xf32>
    %14 = vector.broadcast %13 : vector<1x4xf32> to vector<8x4xf32>
    %15 = arith.addf %12, %14 : vector<8x4xf32>
    %c0_15 = arith.constant 0 : index
    %c0_16 = arith.constant 0 : index
    %16 = vector.load %arg8[%c0_15, %c0_16] : memref<8x4xf32, #tpu.memory_space<vmem>>, vector<8x4xf32>
    tpu.vector_store %arg8[%c0_15, %c0_16], %15 {strides = array<i32>} : memref<8x4xf32, #tpu.memory_space<vmem>>, vector<8x4xf32>,
    return
  }
  func.func @transform_0(%arg0: i32) -> (i32, i32) {
    %c0_i32 = arith.constant 0 : i32
    %c0_i32_0 = arith.constant 0 : i32
    return %arg0, %c0_i32 : i32, i32
  }
  func.func @transform_1(%arg0: i32) -> (i32, i32) {
    %c0_i32 = arith.constant 0 : i32
    %c0_i32_0 = arith.constant 0 : i32
    %c0_i32_1 = arith.constant 0 : i32
    return %c0_i32, %c0_i32_0 : i32, i32
  }
  func.func @transform_2(%arg0: i32) -> (i32, i32) {
    %c0_i32 = arith.constant 0 : i32
    %c0_i32_0 = arith.constant 0 : i32
    %c0_i32_1 = arith.constant 0 : i32
    return %c0_i32, %c0_i32_0 : i32, i32
  }
  func.func @transform_3(%arg0: i32) -> (i32, i32) {
    %c0_i32 = arith.constant 0 : i32
    %c0_i32_0 = arith.constant 0 : i32
    %c0_i32_1 = arith.constant 0 : i32
    return %c0_i32, %c0_i32_0 : i32, i32
  }
  func.func @transform_4(%arg0: i32) -> (i32, i32) {
    %c0_i32 = arith.constant 0 : i32
    %c0_i32_0 = arith.constant 0 : i32
    %c0_i32_1 = arith.constant 0 : i32
    return %c0_i32, %c0_i32_0 : i32, i32
  }
  func.func @transform_5(%arg0: i32) -> (i32, i32) {
    %c0_i32 = arith.constant 0 : i32
    %c0_i32_0 = arith.constant 0 : i32
    %c0_i32_1 = arith.constant 0 : i32
    return %c0_i32, %c0_i32_0 : i32, i32
  }
  func.func @transform_6(%arg0: i32) -> (i32, i32) {
    %c0_i32 = arith.constant 0 : i32
    %c0_i32_0 = arith.constant 0 : i32
    %c0_i32_1 = arith.constant 0 : i32
    return %c0_i32, %c0_i32_0 : i32, i32
  }
  func.func @transform_7(%arg0: i32) -> (i32, i32) {
    %c0_i32 = arith.constant 0 : i32
    %c0_i32_0 = arith.constant 0 : i32
    return %arg0, %c0_i32 : i32, i32
  }
}

</mosaic_0001>

<bundles_post_ra>
// kernel: tpu_custom_call.1
= control target key start
LH: loop header
LB: loop body
LE: loop exit
PB: predicated region body
PF: predicated region fallthrough
CT: control target
= control target key end

     0   :  { %12 = vsyncpa [#allocation3], 0  ;;  %s402_s0 = inlined_call_operand.hbm [shape: f32[8,128], index: 0, kind: input, shape index: {}]   ;;  %s403_s1 = inlined_call_operand.vmem [shape: f32[128,128], index: 1, kind: input, shape index: {}]   ;;  %s404_s2 = inlined_call_operand.vmem [shape: f32[1,128], index: 2, kind: input, shape index: {}]   ;;  %s405_s3 = inlined_call_operand.hbm [shape: f32[128,128], index: 3, kind: input, shape index: {}]   ;;  %s406_s4 = inlined_call_operand.vmem [shape: f32[1,128], index: 4, kind: input, shape index: {}]   ;;  %s407_s5 = inlined_call_operand.vmem [shape: f32[128,4], index: 5, kind: input, shape index: {}]   ;;  %s408_s6 = inlined_call_operand.vmem [shape: f32[1,4], index: 6, kind: input, shape index: {}]   ;;  %s409_s7 = inlined_call_operand.vmem [shape: f32[8,4], index: 7, kind: output, shape index: {}]  }
   0x1   :  { %s19_s26 = sshll.u32 %s402_s0, 4  ;;  %s20_s26 = int_to_ptr.hbm [resolvable:$true] %s19_s26 }
   0x2   :  { %13 = vsyncpa [#allocation5], 0  ;;  %s244_s27 = smov [#allocation2]   ;;  %s33_s8 = sshll.u32 %s405_s3, 4  ;;  %s34_s8 = int_to_ptr.hbm [resolvable:$true] %s33_s8 }
   0x3   :  { %s21_s28 = sshll.u32 %s244_s27, 4  ;;  %s245_s9 = smov [#allocation4]   ;;  %s22_s28 = int_to_ptr.vmem [resolvable:$true] %s21_s28 }
   0x4   :  { %24 = dma.hbm_to_vmem [thread:$0]  %s20_s26, 128, %s22_s28, [#allocation3]  }
   0x5   :  { %s35_s10 = sshll.u32 %s245_s9, 4  ;;  %s246_s11 = smov 128   ;;  %s36_s10 = int_to_ptr.vmem [resolvable:$true] %s35_s10 }
   0x6   :  { %s247_s12 = smov 8  }
   0x7   :  { %41 = dma.hbm_to_vmem [thread:$0]  %s34_s8, 2048, %s36_s10, [#allocation5], %s246_s11, %s246_s11, %s247_s12  }
   0x8   :  { %240 = dma.done.wait [#allocation3], 128  }
   0x9   :  { %241 = vsyncadd [#allocation3], 4294967168 }
   0xa   :  { %242 = dma.done.wait [#allocation5], 2048  }
   0xb   :  { %243 = vsyncadd [#allocation5], 4294965248  ;;  %v72_v0 = vld [vmem:[%s403_s1 + $0x78] sm:$0xff]  ;;  %v71_v1 = vld [vmem:[%s403_s1 + $0x70] sm:$0xff]  ;;  %vm177_vm0 = vcmask 31744  }
   0xc   :  { %77 = vmatpush.msra.mxu0 %v72_v0  ;;  %v70_v2 = vld [vmem:[%s403_s1 + $0x68] sm:$0xff]  ;;  %v69_v3 = vld [vmem:[%s403_s1 + $0x60] sm:$0xff]  ;;  %v68_v5 = vld [vmem:[%s403_s1 + $0x58] sm:$0xff] }
   0xd   :  { %v112_v4 = vld [vmem:[#allocation4 + $0x78] sm:$0xff]  ;;  %v111_v6 = vld [vmem:[#allocation4 + $0x70] sm:$0xff]  ;;  %v110_v7 = vld [vmem:[#allocation4 + $0x68] sm:$0xff] }
   0xe   :  { %78 = vmatpush.msra.mxu0 %v71_v1  ;;  %117 = vmatpush.msra.mxu1 %v112_v4  ;;  %v67_v8 = vld [vmem:[%s403_s1 + $0x50] sm:$0xff]  ;;  %v109_v9 = vld [vmem:[#allocation4 + $0x60] sm:$0xff]  ;;  %v108_v11 = vld [vmem:[#allocation4 + $0x58] sm:$0xff] }
   0xf   :  { %v66_v10 = vld [vmem:[%s403_s1 + $0x48] sm:$0xff]  ;;  %v65_v12 = vld [vmem:[%s403_s1 + $0x40] sm:$0xff]  ;;  %v107_v13 = vld [vmem:[#allocation4 + $0x50] sm:$0xff] }
  0x10   :  { %79 = vmatpush.msra.mxu0 %v70_v2  ;;  %118 = vmatpush.msra.mxu1 %v111_v6  ;;  %v64_v14 = vld [vmem:[%s403_s1 + $0x38] sm:$0xff]  ;;  %v106_v15 = vld [vmem:[#allocation4 + $0x48] sm:$0xff]  ;;  %v105_v17 = vld [vmem:[#allocation4 + $0x40] sm:$0xff] }
  0x11   :  { %v63_v16 = vld [vmem:[%s403_s1 + $0x30] sm:$0xff]  ;;  %v62_v18 = vld [vmem:[%s403_s1 + $0x28] sm:$0xff]  ;;  %v104_v19 = vld [vmem:[#allocation4 + $0x38] sm:$0xff] }
  0x12   :  { %80 = vmatpush.msra.mxu0 %v69_v3  ;;  %119 = vmatpush.msra.mxu1 %v110_v7  ;;  %v61_v20 = vld [vmem:[%s403_s1 + $0x20] sm:$0xff]  ;;  %v103_v21 = vld [vmem:[#allocation4 + $0x30] sm:$0xff]  ;;  %v102_v23 = vld [vmem:[#allocation4 + $0x28] sm:$0xff] }
  0x13   :  { %v60_v22 = vld [vmem:[%s403_s1 + $0x18] sm:$0xff]  ;;  %v59_v24 = vld [vmem:[%s403_s1 + $0x10] sm:$0xff]  ;;  %v101_v25 = vld [vmem:[#allocation4 + $0x20] sm:$0xff] }
  0x14   :  { %81 = vmatpush.msra.mxu0 %v68_v5  ;;  %120 = vmatpush.msra.mxu1 %v109_v9  ;;  %v58_v26 = vld [vmem:[%s403_s1 + $0x8] sm:$0xff]  ;;  %v100_v27 = vld [vmem:[#allocation4 + $0x18] sm:$0xff]  ;;  %v99_v30 = vld [vmem:[#allocation4 + $0x10] sm:$0xff] }
  0x15   :  { %v57_v28 = vld [vmem:[%s403_s1] sm:$0xff]  ;;  %v98_v31 = vld [vmem:[#allocation4 + $0x8] sm:$0xff]  ;;  %v97_v32 = vld [vmem:[#allocation4] sm:$0xff] }
  0x16   :  { %82 = vmatpush.msra.mxu0 %v67_v8  ;;  %121 = vmatpush.msra.mxu1 %v108_v11  ;;  %v56_v29 = vld [vmem:[#allocation2] sm:$0xff]  ;;  %v152_v33 = vld [vmem:[%s407_s5 + $0x78] sm:$0xff]  ;;  %v151_v34 = vld [vmem:[%s407_s5 + $0x70] sm:$0xff] }
  0x17   :  { %157 = vmatpush.msra.mxu2 %v152_v33  ;;  %v150_v35 = vld [vmem:[%s407_s5 + $0x68] sm:$0xff]  ;;  %v149_v36 = vld [vmem:[%s407_s5 + $0x60] sm:$0xff]  ;;  %v148_v37 = vld [vmem:[%s407_s5 + $0x58] sm:$0xff] }
  0x18   :  { %83 = vmatpush.msra.mxu0 %v66_v10  ;;  %122 = vmatpush.msra.mxu1 %v107_v13  ;;  %v147_v38 = vld [vmem:[%s407_s5 + $0x50] sm:$0xff]  ;;  %v146_v39 = vld [vmem:[%s407_s5 + $0x48] sm:$0xff]  ;;  %v145_v40 = vld [vmem:[%s407_s5 + $0x40] sm:$0xff] }
  0x19   :  { %158 = vmatpush.msra.mxu2 %v151_v34  ;;  %v144_v41 = vld [vmem:[%s407_s5 + $0x38] sm:$0xff]  ;;  %v143_v42 = vld [vmem:[%s407_s5 + $0x30] sm:$0xff]  ;;  %v142_v43 = vld [vmem:[%s407_s5 + $0x28] sm:$0xff] }
  0x1a   :  { %84 = vmatpush.msra.mxu0 %v65_v12  ;;  %123 = vmatpush.msra.mxu1 %v106_v15  ;;  %v141_v44 = vld [vmem:[%s407_s5 + $0x20] sm:$0xff]  ;;  %v140_v45 = vld [vmem:[%s407_s5 + $0x18] sm:$0xff]  ;;  %v139_v46 = vld [vmem:[%s407_s5 + $0x10] sm:$0xff] }
  0x1b   :  { %159 = vmatpush.msra.mxu2 %v150_v35  ;;  %v189_v47 = vld [vmem:[%s404_s2] ss:$0 sm:$0xff]  ;;  %v138_v50 = vld [vmem:[%s407_s5 + $0x8] sm:$0xff] }
  0x1c   :  { %85 = vmatpush.msra.mxu0 %v64_v14  ;;  %124 = vmatpush.msra.mxu1 %v105_v17  ;;  %v137_v51 = vld [vmem:[%s407_s5] sm:$0xff] }
  0x1d   :  { %160 = vmatpush.msra.mxu2 %v149_v36  ;;  %v190_v52 = vld [vmem:[%s406_s4] ss:$0 sm:$0xff] }
  0x1e   :  { %86 = vmatpush.msra.mxu0 %v63_v16  ;;  %125 = vmatpush.msra.mxu1 %v104_v19  ;;  %v191_v55 = vld [vmem:[%s408_s6] ss:$0 sm:$0xff] }
  0x1f   :  { %161 = vmatpush.msra.mxu2 %v148_v37 }
  0x20   :  { %87 = vmatpush.msra.mxu0 %v62_v18  ;;  %126 = vmatpush.msra.mxu1 %v103_v21 }
  0x21   :  { %162 = vmatpush.msra.mxu2 %v147_v38 }
  0x22   :  { %88 = vmatpush.msra.mxu0 %v61_v20  ;;  %127 = vmatpush.msra.mxu1 %v102_v23 }
  0x23   :  { %163 = vmatpush.msra.mxu2 %v146_v39 }
  0x24   :  { %89 = vmatpush.msra.mxu0 %v60_v22  ;;  %128 = vmatpush.msra.mxu1 %v101_v25 }
  0x25   :  { %164 = vmatpush.msra.mxu2 %v145_v40 }
  0x26   :  { %90 = vmatpush.msra.mxu0 %v59_v24  ;;  %129 = vmatpush.msra.mxu1 %v100_v27 }
  0x27   :  { %165 = vmatpush.msra.mxu2 %v144_v41 }
  0x28   :  { %91 = vmatpush.msra.mxu0 %v58_v26  ;;  %130 = vmatpush.msra.mxu1 %v99_v30 }
  0x29   :  { %166 = vmatpush.msra.mxu2 %v143_v42 }
  0x2a   :  { %92 = vmatpush.msra.mxu0 %v57_v28  ;;  %131 = vmatpush.msra.mxu1 %v98_v31 }
  0x2b   :  { %93 = vmatmul.f32.vlgmr.msra.gmra.mxu0 %v56_v29  ;;  %167 = vmatpush.msra.mxu2 %v142_v43 }
  0x2c   :  { %132 = vmatpush.msra.mxu1 %v97_v32 }
  0x2d   :  { %168 = vmatpush.msra.mxu2 %v141_v44 }
  0x2f   :  { %169 = vmatpush.msra.mxu2 %v140_v45 }
  0x31   :  { %170 = vmatpush.msra.mxu2 %v139_v46 }
  0x33   :  { %171 = vmatpush.msra.mxu2 %v138_v50 }
  0x35   :  { %172 = vmatpush.msra.mxu2 %v137_v51 }
  0xa8   :  { %v94_v48 = vpop.f32.mrf.mxu0 }
  0xa9   :  { %v95_v49 = vadd.f32 %v189_v47, %v94_v48 }
  0xab   :  { %133 = vmatmul.f32.vlgmr.msra.gmra.mxu1 %v95_v49 }
 0x128   :  { %v134_v53 = vpop.f32.mrf.mxu1 }
 0x129   :  { %v135_v54 = vadd.f32 %v190_v52, %v134_v53 }
 0x12b   :  { %173 = vmatmul.f32.vlgmr.msra.gmra.mxu2 %v135_v54 }
 0x1ae   :  { %v174_v56 = vpop.f32.mrf.mxu2 }
 0x1af   :  { %v175_v57 = vadd.f32 %v191_v55, %v174_v56 }
 0x1b1   :  { %178 = vst.msk [vmem:[%s409_s7] sm:$0xff] %vm177_vm0, %v175_v57 }
 0x1b2   :  { %183 = vsyncpa [#allocation3], 1 }
 0x1b3   :  { %184 = vsyncpa [#allocation5], 1 }

</bundles_post_ra>
